<compile_context>
chip_gen: v5e
topology: v5e:2x2
jax: 0.10.0
libtpu: 0.0.40
codegen_flags: <defaults>
</compile_context>

<pallas_src>
import functools

import jax
import jax.numpy as jnp
from jax.experimental import pallas as pl
from jax.experimental.pallas import tpu as pltpu

_LANE = 128


def _round_up(x, m):
    return ((x + m - 1) // m) * m


def _vmem_capacity_bytes():
    try:
        return int(pltpu.get_tpu_info().vmem_capacity_bytes)
    except Exception:
        # Conservative fallback (v7x per-TensorCore VMEM).
        return 64 * 1024 * 1024


# --------------------------------------------------------------------------
# Kernels
# --------------------------------------------------------------------------
def _mlp_kernel_fused(x_ref, w1_ref, b1_ref, w2_ref, b2_ref, o_ref):
    """No-reduction fast path (weights resident, n_h == 1)."""
    h = jnp.dot(x_ref[...], w1_ref[...], preferred_element_type=jnp.float32)
    h = jnp.maximum(h + b1_ref[...], 0.0)
    y = jnp.dot(h.astype(w2_ref.dtype), w2_ref[...],
                preferred_element_type=jnp.float32)
    o_ref[...] = (y + b2_ref[...]).astype(o_ref.dtype)


def _mlp_kernel_acc(x_ref, w1_ref, b1_ref, w2_ref, b2_ref, o_ref, acc_ref):
    """Hidden-dim reduction path: one (batch-tile, hidden-tile) step."""
    h_idx = pl.program_id(1)

    @pl.when(h_idx == 0)
    def _():
        acc_ref[...] = jnp.zeros_like(acc_ref)

    h = jnp.dot(x_ref[...], w1_ref[...], preferred_element_type=jnp.float32)
    h = jnp.maximum(h + b1_ref[...], 0.0)
    acc_ref[...] += jnp.dot(h.astype(w2_ref.dtype), w2_ref[...],
                            preferred_element_type=jnp.float32)

    @pl.when(h_idx == pl.num_programs(1) - 1)
    def _():
        o_ref[...] = (acc_ref[...] + b2_ref[...]).astype(o_ref.dtype)


# --------------------------------------------------------------------------
# One-time weight preparation (hoisted out of the per-call path)
# --------------------------------------------------------------------------
def prepare_mlp_params(w1, b1, w2, b2, *, tile_hidden=512, allow_resident=True,
                       tile_batch_hint=512, out_itemsize=4):
    """Pad & cast the MLP weights once.

    w1: [D_in, H]   (pre-transposed vs PyTorch's [H, D_in])
    b1: [H]
    w2: [H, D_out]  (pre-transposed)
    b2: [D_out]
    """
    D_in, H = w1.shape
    D_out = w2.shape[1]
    D_in_p = _round_up(D_in, _LANE)
    D_out_p = _round_up(D_out, _LANE)
    H_lane = _round_up(H, _LANE)

    budget = int(0.75 * _vmem_capacity_bytes())

    # Can full weights stay resident in VMEM alongside double-buffered x/out
    # tiles and the fp32 intermediates?  (Counts 2 buffers per block.)
    tb = tile_batch_hint
    resident_bytes = (
        2 * (D_in_p * H_lane + H_lane * D_out_p) * 2      # w1/w2 bf16 blocks
        + 2 * 8 * (H_lane + D_out_p) * 4                  # b1/b2 fp32 (sublane pad)
        + 2 * tb * D_in_p * 2                             # x blocks (bf16)
        + 2 * tb * D_out_p * out_itemsize                 # out blocks
        + tb * H_lane * 4 + tb * D_out_p * 4              # fp32 intermediates
    )
    if allow_resident and resident_bytes <= budget:
        H_p, th, n_h = H_lane, H_lane, 1
    else:
        align = 256 if H_lane >= 256 else _LANE           # 256x256 MXU on v6e/v7x
        th = max(align, min(_round_up(tile_hidden, align),
                            _round_up(H_lane, align)))
        H_p = _round_up(H_lane, th)                       # pad H up to the tile
        n_h = H_p // th

    f32, bf16 = jnp.float32, jnp.bfloat16
    w1p = jnp.zeros((D_in_p, H_p), bf16).at[:D_in, :H].set(w1.astype(bf16))
    b1p = jnp.zeros((1, H_p), f32).at[0, :H].set(b1.astype(f32).reshape(-1))
    w2p = jnp.zeros((H_p, D_out_p), bf16).at[:H, :D_out].set(w2.astype(bf16))
    b2p = jnp.zeros((1, D_out_p), f32).at[0, :D_out].set(b2.astype(f32).reshape(-1))

    return dict(w1p=w1p, b1p=b1p, w2p=w2p, b2p=b2p,
                D_in=D_in, H=H, D_out=D_out,
                D_in_p=D_in_p, H_p=H_p, D_out_p=D_out_p,
                tile_hidden=th, n_h=n_h, vmem_budget=budget)


# --------------------------------------------------------------------------
# Jitted pallas_call wrapper (static tiling decided outside jit)
# --------------------------------------------------------------------------
@functools.partial(
    jax.jit,
    static_argnames=("B_p", "tile_batch", "tile_hidden", "n_h", "D_out",
                     "out_dtype", "vmem_limit"))
def _mlp_pallas(x, w1p, b1p, w2p, b2p, *, B_p, tile_batch, tile_hidden, n_h,
                D_out, out_dtype, vmem_limit):
    B, D_in = x.shape
    D_in_p, H_p = w1p.shape
    D_out_p = w2p.shape[1]

    xp = jnp.zeros((B_p, D_in_p), jnp.bfloat16).at[:B, :D_in].set(
        x.astype(jnp.bfloat16))
    n_b = B_p // tile_batch

    if n_h == 1:
        grid = (n_b,)
        in_specs = [
            pl.BlockSpec((tile_batch, D_in_p), lambda i: (i, 0)),
            pl.BlockSpec((D_in_p, H_p), lambda i: (0, 0)),       # w1 resident
            pl.BlockSpec((1, H_p), lambda i: (0, 0)),            # b1 resident
            pl.BlockSpec((H_p, D_out_p), lambda i: (0, 0)),      # w2 resident
            pl.BlockSpec((1, D_out_p), lambda i: (0, 0)),        # b2 resident
        ]
        out_spec = pl.BlockSpec((tile_batch, D_out_p), lambda i: (i, 0))
        kernel = _mlp_kernel_fused
        scratch = []
        dims = ("parallel",)
    else:
        grid = (n_b, n_h)
        in_specs = [
            # x tile constant over the hidden axis -> not re-fetched per h.
            pl.BlockSpec((tile_batch, D_in_p), lambda i, h: (i, 0)),
            pl.BlockSpec((D_in_p, tile_hidden), lambda i, h: (0, h)),
            pl.BlockSpec((1, tile_hidden), lambda i, h: (0, h)),
            pl.BlockSpec((tile_hidden, D_out_p), lambda i, h: (h, 0)),
            pl.BlockSpec((1, D_out_p), lambda i, h: (0, 0)),
        ]
        out_spec = pl.BlockSpec((tile_batch, D_out_p), lambda i, h: (i, 0))
        kernel = _mlp_kernel_acc
        scratch = [pltpu.VMEM((tile_batch, D_out_p), jnp.float32)]
        dims = ("parallel", "arbitrary")

    out_p = pl.pallas_call(
        kernel,
        out_shape=jax.ShapeDtypeStruct((B_p, D_out_p), out_dtype),
        grid_spec=pltpu.PrefetchScalarGridSpec(
            num_scalar_prefetch=0,
            grid=grid,
            in_specs=in_specs,
            out_specs=out_spec,
            scratch_shapes=scratch,
        ),
        compiler_params=pltpu.CompilerParams(
            dimension_semantics=dims,
            vmem_limit_bytes=vmem_limit,
        ),
    )(xp, w1p, b1p, w2p, b2p)

    return out_p[:B, :D_out]


# --------------------------------------------------------------------------
# Public forward
# --------------------------------------------------------------------------
def mlp_forward(x, params, *, tile_batch=512, out_dtype=jnp.float32):
    """Fused relu(x @ w1 + b1) @ w2 + b2 using pre-prepared padded weights."""
    B = x.shape[0]
    D_in_p, H_p, D_out_p = params["D_in_p"], params["H_p"], params["D_out_p"]
    th, n_h = params["tile_hidden"], params["n_h"]
    budget = params["vmem_budget"]
    out_itemsize = jnp.dtype(out_dtype).itemsize

    # Batch tile: multiple of 16 (bf16 packs 16 sublanes/vreg); keep at least
    # two batch tiles when B allows so v7x's second TensorCore gets work.
    tb = max(16, min(_round_up(tile_batch, 16), _round_up(B, 16)))
    if B > 16:
        tb = min(tb, _round_up((B + 1) // 2, 16))

    def vmem_est(tb_):
        if n_h == 1:
            return (2 * tb_ * D_in_p * 2
                    + 2 * (D_in_p * H_p + H_p * D_out_p) * 2
                    + 2 * 8 * (H_p + D_out_p) * 4
                    + 2 * tb_ * D_out_p * out_itemsize
                    + tb_ * H_p * 4 + tb_ * D_out_p * 4)
        return (2 * tb_ * D_in_p * 2
                + 2 * (D_in_p * th + th * D_out_p) * 2
                + 2 * 8 * (th + D_out_p) * 4
                + 2 * tb_ * D_out_p * out_itemsize
                + tb_ * D_out_p * 4 + tb_ * th * 4)

    while tb > 16 and vmem_est(tb) > budget:
        tb = max(16, _round_up(tb // 2, 16))

    B_p = _round_up(B, tb)
    vmem_limit = int(min(budget, max(vmem_est(tb) + (4 << 20), 16 << 20)))

    return _mlp_pallas(x, params["w1p"], params["b1p"], params["w2p"],
                       params["b2p"], B_p=B_p, tile_batch=tb, tile_hidden=th,
                       n_h=n_h, D_out=params["D_out"], out_dtype=out_dtype,
                       vmem_limit=vmem_limit)


if __name__ == "__main__":
    # Shapes consistent with MLP(args, input_dim, output_dim):
    #   input_dim=32, args.linear_dim=128, output_dim=16.
    batch, input_dim, linear_dim, output_dim = 256, 32, 128, 16

    key = jax.random.PRNGKey(0)
    kx, kw1, kb1, kw2, kb2 = jax.random.split(key, 5)

    # PyTorch nn.Linear default init: U(-1/sqrt(fan_in), 1/sqrt(fan_in)).
    bound1 = 1.0 / (input_dim ** 0.5)
    bound2 = 1.0 / (linear_dim ** 0.5)
    x = jax.random.normal(kx, (batch, input_dim), jnp.float32)
    w1 = jax.random.uniform(kw1, (input_dim, linear_dim), jnp.float32, -bound1, bound1)
    b1 = jax.random.uniform(kb1, (linear_dim,), jnp.float32, -bound1, bound1)
    w2 = jax.random.uniform(kw2, (linear_dim, output_dim), jnp.float32, -bound2, bound2)
    b2 = jax.random.uniform(kb2, (output_dim,), jnp.float32, -bound2, bound2)

    # ---- resident-weight fast path (n_h == 1, grid = (2,)) -----------------
    params = prepare_mlp_params(w1, b1, w2, b2)
    out = jax.block_until_ready(mlp_forward(x, params, tile_batch=512))
    assert out.shape == (batch, output_dim)

    # Pure-JAX reference matching the kernel's bf16-input / fp32-accumulate numerics.
    xb = x.astype(jnp.bfloat16).astype(jnp.float32)
    w1b = w1.astype(jnp.bfloat16).astype(jnp.float32)
    w2b = w2.astype(jnp.bfloat16).astype(jnp.float32)
    h_ref = jnp.maximum(xb @ w1b + b1, 0.0)
    ref = h_ref.astype(jnp.bfloat16).astype(jnp.float32) @ w2b + b2
    assert jnp.allclose(out, ref, atol=2e-2, rtol=2e-2), "mismatch (fused path)"

    # ---- hidden-reduction (accumulator) path (n_h == 2, grid = (2, 2)) -----
    linear_dim2 = 512
    bound1b = 1.0 / (input_dim ** 0.5)
    bound2b = 1.0 / (linear_dim2 ** 0.5)
    kw1b, kb1b, kw2b, kb2b = jax.random.split(jax.random.PRNGKey(1), 4)
    w1_2 = jax.random.uniform(kw1b, (input_dim, linear_dim2), jnp.float32, -bound1b, bound1b)
    b1_2 = jax.random.uniform(kb1b, (linear_dim2,), jnp.float32, -bound1b, bound1b)
    w2_2 = jax.random.uniform(kw2b, (linear_dim2, output_dim), jnp.float32, -bound2b, bound2b)
    b2_2 = jax.random.uniform(kb2b, (output_dim,), jnp.float32, -bound2b, bound2b)

    params2 = prepare_mlp_params(w1_2, b1_2, w2_2, b2_2,
                                 tile_hidden=256, allow_resident=False)
    out2 = jax.block_until_ready(mlp_forward(x, params2, tile_batch=128))
    assert out2.shape == (batch, output_dim)

    w1_2b = w1_2.astype(jnp.bfloat16).astype(jnp.float32)
    w2_2b = w2_2.astype(jnp.bfloat16).astype(jnp.float32)
    h2 = jnp.maximum(xb @ w1_2b + b1_2, 0.0)
    ref2 = h2.astype(jnp.bfloat16).astype(jnp.float32) @ w2_2b + b2_2
    assert jnp.allclose(out2, ref2, atol=3e-2, rtol=3e-2), "mismatch (acc path)"

    print("KERNEL_OK")
</pallas_src>

<mosaic_0001>
module attributes {stable_mosaic.version = 11 : i64} {
  func.func @_mlp_kernel_fused(%arg0: i32, %arg1: memref<128x128xbf16, #tpu.memory_space<vmem>>, %arg2: memref<128x128xbf16, #tpu.memory_space<vmem>>, %arg3: memref<1x128xf32, #tpu.memory_space<vmem>>, %arg4: memref<128x128xbf16, #tpu.memory_space<vmem>>, %arg5: memref<1x128xf32, #tpu.memory_space<vmem>>, %arg6: memref<128x128xf32, #tpu.memory_space<vmem>>) attributes {dimension_semantics = [#tpu.dimension_semantics<parallel>], iteration_bounds = array<i64: 2>, scalar_prefetch = 0 : i64, scratch_operands = 0 : i64, tpu.core_type = #tpu.core_type<tc>, window_params = [{transform_indices = @transform_0, window_bounds = array<i64: 128, 128>}, {pipeline_mode = #tpu.pipeline_mode<synchronous>, transform_indices = @transform_1, window_bounds = array<i64: 128, 128>}, {pipeline_mode = #tpu.pipeline_mode<synchronous>, transform_indices = @transform_2, window_bounds = array<i64: 1, 128>}, {pipeline_mode = #tpu.pipeline_mode<synchronous>, transform_indices = @transform_3, window_bounds = array<i64: 128, 128>}, {pipeline_mode = #tpu.pipeline_mode<synchronous>, transform_indices = @transform_4, window_bounds = array<i64: 1, 128>}, {transform_indices = @transform_5, window_bounds = array<i64: 128, 128>}]} {
    %c0 = arith.constant 0 : index
    %c0_0 = arith.constant 0 : index
    %0 = vector.load %arg1[%c0, %c0_0] : memref<128x128xbf16, #tpu.memory_space<vmem>>, vector<128x128xbf16>
    %c0_1 = arith.constant 0 : index
    %c0_2 = arith.constant 0 : index
    %1 = vector.load %arg2[%c0_1, %c0_2] : memref<128x128xbf16, #tpu.memory_space<vmem>>, vector<128x128xbf16>
    %cst = arith.constant dense<0.000000e+00> : vector<128x128xf32>
    %2 = tpu.matmul %0, %1, %cst {dimension_numbers = #tpu.dot_dimension_numbers<[1], [0], [0], [1], [0, 0, 1, 1], [], []>} : vector<128x128xbf16>, vector<128x128xbf16>, vector<128x128xf32> -> vector<128x128xf32>
    %c0_3 = arith.constant 0 : index
    %c0_4 = arith.constant 0 : index
    %3 = vector.load %arg3[%c0_3, %c0_4] : memref<1x128xf32, #tpu.memory_space<vmem>>, vector<1x128xf32>
    %4 = vector.broadcast %3 : vector<1x128xf32> to vector<128x128xf32>
    %5 = arith.addf %2, %4 : vector<128x128xf32>
    %cst_5 = arith.constant 0.000000e+00 : f32
    %6 = vector.broadcast %cst_5 : f32 to vector<128x128xf32>
    %7 = arith.maximumf %5, %6 : vector<128x128xf32>
    %8 = arith.truncf %7 : vector<128x128xf32> to vector<128x128xbf16>
    %c0_6 = arith.constant 0 : index
    %c0_7 = arith.constant 0 : index
    %9 = vector.load %arg4[%c0_6, %c0_7] : memref<128x128xbf16, #tpu.memory_space<vmem>>, vector<128x128xbf16>
    %cst_8 = arith.constant dense<0.000000e+00> : vector<128x128xf32>
    %10 = tpu.matmul %8, %9, %cst_8 {dimension_numbers = #tpu.dot_dimension_numbers<[1], [0], [0], [1], [0, 0, 1, 1], [], []>} : vector<128x128xbf16>, vector<128x128xbf16>, vector<128x128xf32> -> vector<128x128xf32>
    %c0_9 = arith.constant 0 : index
    %c0_10 = arith.constant 0 : index
    %11 = vector.load %arg5[%c0_9, %c0_10] : memref<1x128xf32, #tpu.memory_space<vmem>>, vector<1x128xf32>
    %12 = vector.broadcast %11 : vector<1x128xf32> to vector<128x128xf32>
    %13 = arith.addf %10, %12 : vector<128x128xf32>
    %c0_11 = arith.constant 0 : index
    %c0_12 = arith.constant 0 : index
    %14 = vector.load %arg6[%c0_11, %c0_12] : memref<128x128xf32, #tpu.memory_space<vmem>>, vector<128x128xf32>
    tpu.vector_store %arg6[%c0_11, %c0_12], %13 {strides = array<i32>} : memref<128x128xf32, #tpu.memory_space<vmem>>, vector<128x128xf32>,
    return
  }
  func.func @transform_0(%arg0: i32) -> (i32, i32) {
    %c0_i32 = arith.constant 0 : i32
    %c0_i32_0 = arith.constant 0 : i32
    return %arg0, %c0_i32 : i32, i32
  }
  func.func @transform_1(%arg0: i32) -> (i32, i32) {
    %c0_i32 = arith.constant 0 : i32
    %c0_i32_0 = arith.constant 0 : i32
    %c0_i32_1 = arith.constant 0 : i32
    return %c0_i32, %c0_i32_0 : i32, i32
  }
  func.func @transform_2(%arg0: i32) -> (i32, i32) {
    %c0_i32 = arith.constant 0 : i32
    %c0_i32_0 = arith.constant 0 : i32
    %c0_i32_1 = arith.constant 0 : i32
    return %c0_i32, %c0_i32_0 : i32, i32
  }
  func.func @transform_3(%arg0: i32) -> (i32, i32) {
    %c0_i32 = arith.constant 0 : i32
    %c0_i32_0 = arith.constant 0 : i32
    %c0_i32_1 = arith.constant 0 : i32
    return %c0_i32, %c0_i32_0 : i32, i32
  }
  func.func @transform_4(%arg0: i32) -> (i32, i32) {
    %c0_i32 = arith.constant 0 : i32
    %c0_i32_0 = arith.constant 0 : i32
    %c0_i32_1 = arith.constant 0 : i32
    return %c0_i32, %c0_i32_0 : i32, i32
  }
  func.func @transform_5(%arg0: i32) -> (i32, i32) {
    %c0_i32 = arith.constant 0 : i32
    %c0_i32_0 = arith.constant 0 : i32
    return %arg0, %c0_i32 : i32, i32
  }
}

</mosaic_0001>

<bundles_post_ra>
// kernel: _mlp_pallas.1
= control target key start
LH: loop header
LB: loop body
LE: loop exit
PB: predicated region body
PF: predicated region fallthrough
CT: control target
= control target key end

     0   :  { %s817_s18 = smov 0   ;;  %s910_s0 = inlined_call_operand.vmem [shape: bf16[256,128], index: 0, kind: input, shape index: {}]   ;;  %s911_s1 = inlined_call_operand.vmem [shape: bf16[128,128], index: 1, kind: input, shape index: {}]   ;;  %s912_s2 = inlined_call_operand.vmem [shape: f32[1,128], index: 2, kind: input, shape index: {}]   ;;  %s913_s3 = inlined_call_operand.vmem [shape: bf16[128,128], index: 3, kind: input, shape index: {}]   ;;  %s914_s4 = inlined_call_operand.vmem [shape: f32[1,128], index: 4, kind: input, shape index: {}]   ;;  %s915_s5 = inlined_call_operand.vmem [shape: f32[256,128], index: 5, kind: output, shape index: {}]  }
   0x1 LB: > { %s622_s19 = sadd.s32 4294967295, %s785_s18   ;;  %p626_p0 = scmp.ge.s32.totalorder %s785_s18, 1  ;;  %s785_s18 = sphi %s817_s18, %s15_s18  }
   0x2   : > { %p188_p1 = scmp.lt.s32.totalorder %s785_s18, 3 }
   0x4   : > { %p189_p2 = pnand %p626_p0, %p188_p1 }
   0x5   : > { %s627_s28 = sshll.u32 (!%p189_p2), %s622_s19, 4 }
   0x6   : > { %192 = sbr.rel (%p189_p2) target bundleno = 380 (0x17c), region = 40  ;;  %p217_p3 = scmp.lt.s32.totalorder (!%p189_p2), %s627_s28, 31 }
   0xb   : > { %v744_v0 = vld [vmem:[%s911_s1 + $0x38] sm:$0xff]  ;;  %v743_v1 = vld [vmem:[%s911_s1 + $0x30] sm:$0xff]  ;;  %v742_v2 = vld [vmem:[%s911_s1 + $0x28] sm:$0xff]  ;;  %s917_s28 = smov (!%p217_p3, %s627_s28), 31 }
   0xc   : > { %360 = vmatpush.bf16.msra.mxu0 %v744_v0  ;;  %753 = vmatpush.bf16.msra.mxu2 %v744_v0  ;;  %v741_v3 = vld [vmem:[%s911_s1 + $0x20] sm:$0xff]  ;;  %v740_v4 = vld [vmem:[%s911_s1 + $0x18] sm:$0xff]  ;;  %v739_v5 = vld [vmem:[%s911_s1 + $0x10] sm:$0xff]  ;;  %s628_s10 = sshll.u32 %s917_s28, 2  ;;  %s630_s11 = sshll.u32 %s917_s28, 3 }
   0xd   : > { %v738_v6 = vld [vmem:[%s911_s1 + $0x8] sm:$0xff]  ;;  %v737_v7 = vld [vmem:[%s911_s1] sm:$0xff]  ;;  %s220_s15 = scalar_lea.vmem %s910_s0, %s628_s10  ;;  %v752_v12 = vld [vmem:[%s913_s3 + $0x38] sm:$0xff]  ;;  %s889_s16 = scalar_lea.vmem %s915_s5, %s630_s11 }
   0xe   : > { %v729_v8 = vld [vmem:[%s220_s15] sm:$0xff]  ;;  %v730_v10 = vld [vmem:[%s220_s15 + $0x8] sm:$0xff]  ;;  %501 = vmatpush.bf16.msra.mxu1 %v752_v12  ;;  %v751_v13 = vld [vmem:[%s913_s3 + $0x30] sm:$0xff]  ;;  %761 = vmatpush.bf16.msra.mxu3 %v752_v12 }
   0xf   : > { %v733_v9 = vld [vmem:[%s220_s15 + $0x20] sm:$0xff]  ;;  %v734_v11 = vld [vmem:[%s220_s15 + $0x28] sm:$0xff]  ;;  %v731_v16 = vld [vmem:[%s220_s15 + $0x10] sm:$0xff] }
  0x10   : > { %361 = vmatpush.bf16.msra.mxu0 %v743_v1  ;;  %754 = vmatpush.bf16.msra.mxu2 %v743_v1  ;;  %v750_v14 = vld [vmem:[%s913_s3 + $0x28] sm:$0xff]  ;;  %v749_v15 = vld [vmem:[%s913_s3 + $0x20] sm:$0xff]  ;;  %v735_v17 = vld [vmem:[%s220_s15 + $0x30] sm:$0xff] }
  0x11   : > { %v732_v18 = vld [vmem:[%s220_s15 + $0x18] sm:$0xff]  ;;  %v747_v21 = vld [vmem:[%s913_s3 + $0x10] sm:$0xff]  ;;  %v746_v22 = vld [vmem:[%s913_s3 + $0x8] sm:$0xff] }
  0x12   : > { %502 = vmatpush.bf16.msra.mxu1 %v751_v13  ;;  %762 = vmatpush.bf16.msra.mxu3 %v751_v13  ;;  %v736_v19 = vld [vmem:[%s220_s15 + $0x38] sm:$0xff]  ;;  %v745_v23 = vld [vmem:[%s913_s3] sm:$0xff] }
  0x13   : > { %v748_v20 = vld [vmem:[%s913_s3 + $0x18] sm:$0xff]  ;;  %v777_v25 = vld [vmem:[%s912_s2] ss:$0 sm:$0xff] }
  0x14   : > { %362 = vmatpush.bf16.msra.mxu0 %v742_v2  ;;  %755 = vmatpush.bf16.msra.mxu2 %v742_v2 }
  0x16   : > { %503 = vmatpush.bf16.msra.mxu1 %v750_v14  ;;  %763 = vmatpush.bf16.msra.mxu3 %v750_v14 }
  0x18   : > { %363 = vmatpush.bf16.msra.mxu0 %v741_v3  ;;  %756 = vmatpush.bf16.msra.mxu2 %v741_v3 }
  0x1a   : > { %504 = vmatpush.bf16.msra.mxu1 %v749_v15  ;;  %764 = vmatpush.bf16.msra.mxu3 %v749_v15 }
  0x1c   : > { %364 = vmatpush.bf16.msra.mxu0 %v740_v4  ;;  %757 = vmatpush.bf16.msra.mxu2 %v740_v4 }
  0x1e   : > { %505 = vmatpush.bf16.msra.mxu1 %v748_v20  ;;  %765 = vmatpush.bf16.msra.mxu3 %v748_v20 }
  0x20   : > { %365 = vmatpush.bf16.msra.mxu0 %v739_v5  ;;  %758 = vmatpush.bf16.msra.mxu2 %v739_v5 }
  0x22   : > { %506 = vmatpush.bf16.msra.mxu1 %v747_v21  ;;  %766 = vmatpush.bf16.msra.mxu3 %v747_v21 }
  0x24   : > { %366 = vmatpush.bf16.msra.mxu0 %v738_v6  ;;  %759 = vmatpush.bf16.msra.mxu2 %v738_v6 }
  0x26   : > { %507 = vmatpush.bf16.msra.mxu1 %v746_v22  ;;  %767 = vmatpush.bf16.msra.mxu3 %v746_v22 }
  0x28   : > { %367 = vmatpush.bf16.msra.mxu0 %v737_v7  ;;  %760 = vmatpush.bf16.msra.mxu2 %v737_v7 }
  0x2a   : > { %508 = vmatpush.bf16.msra.mxu1 %v745_v23  ;;  %768 = vmatpush.bf16.msra.mxu3 %v745_v23 }
  0x2b   : > { %368 = vmatmul.bf16.vlgmr.msra.gmra.mxu0 %v729_v8  ;;  %388 = vmatmul.bf16.vlgmr.msra.gmra.mxu2 %v733_v9 }
  0x3b   : > { %373 = vmatmul.bf16.gmra.mxu0 %v730_v10  ;;  %393 = vmatmul.bf16.gmra.mxu2 %v734_v11 }
  0x4b   : > { %378 = vmatmul.bf16.gmra.mxu0 %v731_v16  ;;  %398 = vmatmul.bf16.gmra.mxu2 %v735_v17  ;;  %v778_v17 = vld [vmem:[%s914_s4] ss:$0 sm:$0xff] }
  0x5b   : > { %383 = vmatmul.bf16.gmra.mxu0 %v732_v18  ;;  %403 = vmatmul.bf16.gmra.mxu2 %v736_v19 }
  0xa8   : > { %v369_v24 = vpop.f32.mrf.mxu0 }
  0xa9   : > { %v370_v26 = vadd.f32 %v777_v25, %v369_v24 }
  0xab   : > { %v409_v29 = vmax.f32 %v370_v26, 0.0 }
  0xae   : > { %v389_v27 = vpop.f32.mrf.mxu2 }
  0xaf   : > { %v390_v32 = vadd.f32 %v777_v25, %v389_v27 }
  0xb0   : > { %v371_v28 = vpop.f32.mrf.mxu0 }
  0xb1   : > { %v372_v30 = vadd.f32 %v777_v25, %v371_v28  ;;  %v417_v37 = vmax.f32 %v390_v32, 0.0 }
  0xb3   : > { %v410_v31 = vmax.f32 %v372_v30, 0.0 }
  0xb5   : > { %v425_v33 = vpack.c.bf16 %v410_v31, %v409_v29 }
  0xb6   : > { %v391_v34 = vpop.f32.mrf.mxu2 }
  0xb7   : > { %v392_v35 = vadd.f32 %v777_v25, %v391_v34  ;;  %509 = vmatmul.bf16.vlgmr.msra.gmra.mxu1 %v425_v33 }
  0xb8   : > { %v374_v36 = vpop.f32.mrf.mxu0 }
  0xb9   : > { %v418_v38 = vmax.f32 %v392_v35, 0.0  ;;  %v375_v40 = vadd.f32 %v777_v25, %v374_v36 }
  0xbb   : > { %v429_v39 = vpack.c.bf16 %v418_v38, %v417_v37  ;;  %v411_v43 = vmax.f32 %v375_v40, 0.0 }
  0xbd   : > { %529 = vmatmul.bf16.vlgmr.msra.gmra.mxu3 %v429_v39 }
  0xbe   : > { %v394_v41 = vpop.f32.mrf.mxu2 }
  0xbf   : > { %v395_v46 = vadd.f32 %v777_v25, %v394_v41 }
  0xc0   : > { %v376_v42 = vpop.f32.mrf.mxu0 }
  0xc1   : > { %v377_v44 = vadd.f32 %v777_v25, %v376_v42  ;;  %v419_v51 = vmax.f32 %v395_v46, 0.0 }
  0xc3   : > { %v412_v45 = vmax.f32 %v377_v44, 0.0 }
  0xc5   : > { %v426_v47 = vpack.c.bf16 %v412_v45, %v411_v43 }
  0xc6   : > { %v396_v48 = vpop.f32.mrf.mxu2 }
  0xc7   : > { %v397_v49 = vadd.f32 %v777_v25, %v396_v48  ;;  %514 = vmatmul.bf16.gmra.mxu1 %v426_v47 }
  0xc8   : > { %v379_v50 = vpop.f32.mrf.mxu0 }
  0xc9   : > { %v420_v52 = vmax.f32 %v397_v49, 0.0  ;;  %v380_v54 = vadd.f32 %v777_v25, %v379_v50 }
  0xcb   : > { %v430_v53 = vpack.c.bf16 %v420_v52, %v419_v51  ;;  %v413_v57 = vmax.f32 %v380_v54, 0.0 }
  0xcd   : > { %534 = vmatmul.bf16.gmra.mxu3 %v430_v53 }
  0xce   : > { %v399_v55 = vpop.f32.mrf.mxu2 }
  0xcf   : > { %v400_v60 = vadd.f32 %v777_v25, %v399_v55 }
  0xd0   : > { %v381_v56 = vpop.f32.mrf.mxu0 }
  0xd1   : > { %v382_v58 = vadd.f32 %v777_v25, %v381_v56  ;;  %v421_v1 = vmax.f32 %v400_v60, 0.0 }
  0xd3   : > { %v414_v59 = vmax.f32 %v382_v58, 0.0 }
  0xd5   : > { %v427_v61 = vpack.c.bf16 %v414_v59, %v413_v57 }
  0xd6   : > { %v401_v62 = vpop.f32.mrf.mxu2 }
  0xd7   : > { %v402_v63 = vadd.f32 %v777_v25, %v401_v62  ;;  %519 = vmatmul.bf16.gmra.mxu1 %v427_v61 }
  0xd8   : > { %v384_v0 = vpop.f32.mrf.mxu0 }
  0xd9   : > { %v422_v2 = vmax.f32 %v402_v63, 0.0  ;;  %v385_v4 = vadd.f32 %v777_v25, %v384_v0 }
  0xdb   : > { %v431_v3 = vpack.c.bf16 %v422_v2, %v421_v1  ;;  %v415_v7 = vmax.f32 %v385_v4, 0.0 }
  0xdd   : > { %539 = vmatmul.bf16.gmra.mxu3 %v431_v3 }
  0xde   : > { %v404_v5 = vpop.f32.mrf.mxu2 }
  0xdf   : > { %v405_v10 = vadd.f32 %v777_v25, %v404_v5 }
  0xe0   : > { %v386_v6 = vpop.f32.mrf.mxu0 }
  0xe1   : > { %v387_v8 = vadd.f32 %v777_v25, %v386_v6  ;;  %v423_v14 = vmax.f32 %v405_v10, 0.0 }
  0xe3   : > { %v416_v9 = vmax.f32 %v387_v8, 0.0 }
  0xe5   : > { %v428_v11 = vpack.c.bf16 %v416_v9, %v415_v7 }
  0xe6   : > { %v406_v12 = vpop.f32.mrf.mxu2 }
  0xe7   : > { %v407_v13 = vadd.f32 %v777_v25, %v406_v12  ;;  %524 = vmatmul.bf16.gmra.mxu1 %v428_v11 }
  0xe9   : > { %v424_v15 = vmax.f32 %v407_v13, 0.0 }
  0xeb   : > { %v432_v16 = vpack.c.bf16 %v424_v15, %v423_v14 }
  0xed   : > { %544 = vmatmul.bf16.gmra.mxu3 %v432_v16 }
 0x134   : > { %v510_v18 = vpop.f32.mrf.mxu1 }
 0x135   : > { %v511_v19 = vadd.f32 %v778_v17, %v510_v18 }
 0x137   : > { %550 = vst [vmem:[%s889_s16] sm:$0xff] %v511_v19 }
 0x13c   : > { %v512_v20 = vpop.f32.mrf.mxu1 }
 0x13d   : > { %v513_v21 = vadd.f32 %v778_v17, %v512_v20 }
 0x13f   : > { %551 = vst [vmem:[%s889_s16 + $0x8] sm:$0xff] %v513_v21 }
 0x140   : > { %v530_v22 = vpop.f32.mrf.mxu3 }
 0x141   : > { %v531_v23 = vadd.f32 %v778_v17, %v530_v22 }
 0x143   : > { %558 = vst [vmem:[%s889_s16 + $0x40] sm:$0xff] %v531_v23 }
 0x144   : > { %v515_v24 = vpop.f32.mrf.mxu1 }
 0x145   : > { %v516_v25 = vadd.f32 %v778_v17, %v515_v24 }
 0x147   : > { %552 = vst [vmem:[%s889_s16 + $0x10] sm:$0xff] %v516_v25 }
 0x148   : > { %v532_v26 = vpop.f32.mrf.mxu3 }
 0x149   : > { %v533_v27 = vadd.f32 %v778_v17, %v532_v26 }
 0x14b   : > { %559 = vst [vmem:[%s889_s16 + $0x48] sm:$0xff] %v533_v27 }
 0x14c   : > { %v517_v28 = vpop.f32.mrf.mxu1 }
 0x14d   : > { %v518_v29 = vadd.f32 %v778_v17, %v517_v28 }
 0x14f   : > { %553 = vst [vmem:[%s889_s16 + $0x18] sm:$0xff] %v518_v29 }
 0x150   : > { %v535_v30 = vpop.f32.mrf.mxu3 }
 0x151   : > { %v536_v31 = vadd.f32 %v778_v17, %v535_v30 }
 0x153   : > { %560 = vst [vmem:[%s889_s16 + $0x50] sm:$0xff] %v536_v31 }
 0x154   : > { %v520_v32 = vpop.f32.mrf.mxu1 }
 0x155   : > { %v521_v33 = vadd.f32 %v778_v17, %v520_v32 }
 0x157   : > { %554 = vst [vmem:[%s889_s16 + $0x20] sm:$0xff] %v521_v33 }
 0x158   : > { %v537_v34 = vpop.f32.mrf.mxu3 }
 0x159   : > { %v538_v35 = vadd.f32 %v778_v17, %v537_v34 }
 0x15b   : > { %561 = vst [vmem:[%s889_s16 + $0x58] sm:$0xff] %v538_v35 }
 0x15c   : > { %v522_v36 = vpop.f32.mrf.mxu1 }
 0x15d   : > { %v523_v37 = vadd.f32 %v778_v17, %v522_v36 }
 0x15f   : > { %555 = vst [vmem:[%s889_s16 + $0x28] sm:$0xff] %v523_v37 }
 0x160   : > { %v540_v38 = vpop.f32.mrf.mxu3 }
 0x161   : > { %v541_v39 = vadd.f32 %v778_v17, %v540_v38 }
 0x163   : > { %562 = vst [vmem:[%s889_s16 + $0x60] sm:$0xff] %v541_v39 }
 0x164   : > { %v525_v40 = vpop.f32.mrf.mxu1 }
 0x165   : > { %v526_v41 = vadd.f32 %v778_v17, %v525_v40 }
 0x167   : > { %556 = vst [vmem:[%s889_s16 + $0x30] sm:$0xff] %v526_v41 }
 0x168   : > { %v542_v42 = vpop.f32.mrf.mxu3 }
 0x169   : > { %v543_v43 = vadd.f32 %v778_v17, %v542_v42 }
 0x16b   : > { %563 = vst [vmem:[%s889_s16 + $0x68] sm:$0xff] %v543_v43 }
 0x16c   : > { %v527_v44 = vpop.f32.mrf.mxu1 }
 0x16d   : > { %v528_v45 = vadd.f32 %v778_v17, %v527_v44 }
 0x16f   : > { %557 = vst [vmem:[%s889_s16 + $0x38] sm:$0xff] %v528_v45 }
 0x170   : > { %v545_v46 = vpop.f32.mrf.mxu3 }
 0x171   : > { %v546_v47 = vadd.f32 %v778_v17, %v545_v46 }
 0x173   : > { %564 = vst [vmem:[%s889_s16 + $0x70] sm:$0xff] %v546_v47 }
 0x178   : > { %v547_v48 = vpop.f32.mrf.mxu3 }
 0x179   : > { %v548_v49 = vadd.f32 %v778_v17, %v547_v48 }
 0x17b   : > { %565 = vst [vmem:[%s889_s16 + $0x78] sm:$0xff] %v548_v49 }
 0x17c PF: > { %s15_s18 = sadd.s32 1, %s785_s18  }
 0x17d   : > { %p12_p4 = scmp.ge.s32.totalorder %s15_s18, 4  }
 0x17f   :  { %14 = sbr.rel (!%p12_p4) target bundleno = 1 (0x1), region = 70 }

</bundles_post_ra>
